<compile_context>
chip_gen: v5e
topology: v5e:2x2
jax: 0.10.0
libtpu: 0.0.40
codegen_flags: <defaults>
</compile_context>

<pallas_src>
import numpy as np
import jax
import jax.numpy as jnp
from jax import lax
from jax.experimental import pallas as pl
from jax.experimental.pallas import tpu as pltpu


def _round_up(x, m):
    return ((x + m - 1) // m) * m


def _cdiv(a, b):
    return (a + b - 1) // b


def _critic_kernel(obs_ref, act_ref,
                   w1_ref, b1_ref,
                   w2h_ref, w2a_ref, b2_ref,
                   w3_ref, b3_ref,
                   out_ref):
    cd = w1_ref.dtype                       # bf16 — weights staged once in make_params
    obs = obs_ref[...].astype(cd)           # in-kernel cast (streamed f32 -> bf16)
    act = act_ref[...].astype(cd)

    # Layer 1: Linear(obs_dim -> H1) + ReLU  (bf16 MXU inputs, f32 accumulate).
    h1 = jnp.dot(obs, w1_ref[...], preferred_element_type=jnp.float32)
    h1 = jnp.maximum(h1 + b1_ref[...], 0.0)

    # Layer 2: concat([h1, act]) @ W2 + b2, ReLU — the concat is a split matmul:
    #   h1 @ W2[:H1] + act @ W2[H1:]
    h2 = (jnp.dot(h1.astype(cd), w2h_ref[...], preferred_element_type=jnp.float32)
          + jnp.dot(act, w2a_ref[...], preferred_element_type=jnp.float32))
    h2 = jnp.maximum(h2 + b2_ref[...], 0.0)

    # Output layer Linear(H2 -> 1) on the MXU: (1, H2) x (TB, H2)^T -> (1, TB).
    # Lands lane-dense directly; f32/HIGHEST keeps the previous f32 numerics.
    q = lax.dot_general(w3_ref[...], h2,
                        dimension_numbers=(((1,), (1,)), ((), ())),
                        preferred_element_type=jnp.float32,
                        precision=lax.Precision.HIGHEST)
    out_ref[...] = (q + b3_ref[0, 0]).astype(out_ref.dtype)


def mlp_critic_forward(obs, act, params, *, block_rows=2048, out_2d=True):
    """Fused MLPCritic forward. obs: (B, obs_dim) f32, act: (B, act_dim) f32.

    Returns (B, 1) f32 (PyTorch parity) or (B,) f32 if out_2d=False (cheaper: skips
    the (1, B) -> (B, 1) relayout).
    """
    B, obs_dim = obs.shape
    act_dim = act.shape[1]
    w1, b1, w2h, w2a, b2, w3, b3 = params
    h1_dim = w1.shape[1]
    h2_dim = w2h.shape[1]

    # Row tile: multiple of 128 so the (1, TB) output block stores lane-dense and the
    # (TB, feat) input blocks satisfy the sublane (8) constraint. For large B keep
    # >= 2 grid steps so the "parallel" batch axis can use both v7x TensorCores.
    tb = _round_up(min(block_rows, max(B, 1)), 128)
    if B > 128:
        tb = min(tb, max(128, _round_up(_cdiv(B, 2), 128)))
    grid = (_cdiv(B, tb),)

    const = lambda i: (0, 0)   # weights/biases: same block every step -> stay resident

    q_row = pl.pallas_call(
        _critic_kernel,
        out_shape=jax.ShapeDtypeStruct((1, B), jnp.float32),
        grid=grid,
        in_specs=[
            pl.BlockSpec((tb, obs_dim), lambda i: (i, 0)),      # obs (streamed f32)
            pl.BlockSpec((tb, act_dim), lambda i: (i, 0)),      # act (streamed f32)
            pl.BlockSpec((obs_dim, h1_dim), const),             # W1   (bf16, resident)
            pl.BlockSpec((1, h1_dim), const),                   # b1   (f32)
            pl.BlockSpec((h1_dim, h2_dim), const),              # W2[:H1] (bf16)
            pl.BlockSpec((act_dim, h2_dim), const),             # W2[H1:] (bf16)
            pl.BlockSpec((1, h2_dim), const),                   # b2   (f32)
            pl.BlockSpec((1, h2_dim), const),                   # w3 row (f32)
            pl.BlockSpec(memory_space=pltpu.MemorySpace.SMEM),  # b3 scalar
        ],
        out_specs=pl.BlockSpec((1, tb), lambda i: (0, i)),      # lane-dense output row
        compiler_params=pltpu.CompilerParams(
            dimension_semantics=("parallel",)),
    )(obs, act, w1, b1, w2h, w2a, b2, w3, b3)

    if out_2d:
        return q_row.reshape(B, 1)   # PyTorch-parity shape; costs a small relayout
    return q_row[0]                  # (B,) — avoids the (1, B) -> (B, 1) relayout


def make_params(key, obs_dim, act_dim, hidden_sizes, weight_dtype=jnp.bfloat16):
    """hidden_sizes = [H1, H2]; biases zero, weights orthogonal (gain=1.0).

    Matmul weights are staged to bf16 ONCE here (not per forward call)."""
    h1, h2 = hidden_sizes
    k1, k2, k3 = jax.random.split(key, 3)
    orth = jax.nn.initializers.orthogonal(scale=1.0)
    # PyTorch Linear stores (out, in); init on that shape, transpose to (in, out).
    w1_t = orth(k1, (h1, obs_dim), jnp.float32)       # Linear(obs_dim, H1)
    w2_t = orth(k2, (h2, h1 + act_dim), jnp.float32)  # Linear(H1+act_dim, H2)
    w3_t = orth(k3, (1, h2), jnp.float32)             # Linear(H2, 1)

    w1 = w1_t.T.astype(weight_dtype)                  # (obs_dim, H1) bf16
    w2 = w2_t.T                                       # (H1+act_dim, H2)
    w2h = w2[:h1, :].astype(weight_dtype)             # split for in-kernel "concat"
    w2a = w2[h1:, :].astype(weight_dtype)
    w3 = w3_t                                         # keep as (1, H2) f32 row
    b1 = jnp.zeros((1, h1), jnp.float32)
    b2 = jnp.zeros((1, h2), jnp.float32)
    b3 = jnp.zeros((1, 1), jnp.float32)
    return (w1, b1, w2h, w2a, b2, w3, b3)


def reference_forward(obs, act, params):
    """Pure-JAX reference with the same bf16-at-the-dot / f32-elementwise recipe."""
    w1, b1, w2h, w2a, b2, w3, b3 = params
    h1 = jnp.maximum(
        jnp.dot(obs.astype(w1.dtype), w1, preferred_element_type=jnp.float32) + b1, 0.0)
    h2 = jnp.maximum(
        jnp.dot(h1.astype(w2h.dtype), w2h, preferred_element_type=jnp.float32)
        + jnp.dot(act.astype(w2a.dtype), w2a, preferred_element_type=jnp.float32)
        + b2, 0.0)
    return jnp.sum(h2 * w3, axis=-1, keepdims=True) + b3


if __name__ == "__main__":
    obs_dim, act_dim = 16, 4
    hidden_sizes = [32, 32]

    key = jax.random.PRNGKey(0)
    k_obs, k_act, k_par = jax.random.split(key, 3)
    params = make_params(k_par, obs_dim, act_dim, hidden_sizes)

    # Small-batch check (B=8 -> single partial 128-row tile, one grid step).
    obs = jax.random.normal(k_obs, (8, obs_dim), jnp.float32)
    act = jax.random.normal(k_act, (8, act_dim), jnp.float32)
    q = jax.block_until_ready(mlp_critic_forward(obs, act, params))
    q_ref = reference_forward(obs, act, params)
    np.testing.assert_allclose(np.asarray(q), np.asarray(q_ref), rtol=5e-4, atol=1e-4)
    assert q.shape == (8, 1)

    # Multi-block grid check: B not a multiple of the tile -> partial last block,
    # resident weights reused across both grid steps.
    obs2 = jax.random.normal(jax.random.PRNGKey(1), (200, obs_dim), jnp.float32)
    act2 = jax.random.normal(jax.random.PRNGKey(2), (200, act_dim), jnp.float32)
    q2 = jax.block_until_ready(mlp_critic_forward(obs2, act2, params))
    q2_ref = reference_forward(obs2, act2, params)
    np.testing.assert_allclose(np.asarray(q2), np.asarray(q2_ref), rtol=5e-4, atol=1e-4)
    assert q2.shape == (200, 1)

    # Lane-major output path (skips the (1, B) -> (B, 1) relayout).
    q2_flat = jax.block_until_ready(mlp_critic_forward(obs2, act2, params, out_2d=False))
    np.testing.assert_allclose(np.asarray(q2_flat), np.asarray(q2_ref[:, 0]),
                               rtol=5e-4, atol=1e-4)

    # TODO(synk): target-network bookkeeping (deepcopy / polyak update / grad toggles)
    # is training-loop state management, not a forward kernel; forward_target is this
    # same kernel invoked with the target params.
    print("KERNEL_OK")
</pallas_src>

<mosaic_0001>
module attributes {stable_mosaic.version = 11 : i64} {
  func.func @_critic_kernel(%arg0: i32, %arg1: memref<128x16xf32, #tpu.memory_space<vmem>>, %arg2: memref<128x4xf32, #tpu.memory_space<vmem>>, %arg3: memref<16x32xbf16, #tpu.memory_space<vmem>>, %arg4: memref<1x32xf32, #tpu.memory_space<vmem>>, %arg5: memref<32x32xbf16, #tpu.memory_space<vmem>>, %arg6: memref<4x32xbf16, #tpu.memory_space<vmem>>, %arg7: memref<1x32xf32, #tpu.memory_space<vmem>>, %arg8: memref<1x32xf32, #tpu.memory_space<vmem>>, %arg9: memref<1x1xf32, #tpu.memory_space<smem>>, %arg10: memref<1x128xf32, #tpu.memory_space<vmem>>) attributes {dimension_semantics = [#tpu.dimension_semantics<parallel>], iteration_bounds = array<i64: 1>, scalar_prefetch = 0 : i64, scratch_operands = 0 : i64, tpu.core_type = #tpu.core_type<tc>, window_params = [{transform_indices = @transform_0, window_bounds = array<i64: 128, 16>}, {transform_indices = @transform_1, window_bounds = array<i64: 128, 4>}, {pipeline_mode = #tpu.pipeline_mode<synchronous>, transform_indices = @transform_2, window_bounds = array<i64: 16, 32>}, {pipeline_mode = #tpu.pipeline_mode<synchronous>, transform_indices = @transform_3, window_bounds = array<i64: 1, 32>}, {pipeline_mode = #tpu.pipeline_mode<synchronous>, transform_indices = @transform_4, window_bounds = array<i64: 32, 32>}, {pipeline_mode = #tpu.pipeline_mode<synchronous>, transform_indices = @transform_5, window_bounds = array<i64: 4, 32>}, {pipeline_mode = #tpu.pipeline_mode<synchronous>, transform_indices = @transform_6, window_bounds = array<i64: 1, 32>}, {pipeline_mode = #tpu.pipeline_mode<synchronous>, transform_indices = @transform_7, window_bounds = array<i64: 1, 32>}, {transform_indices = @transform_8, window_bounds = array<i64: 1, 1>}, {transform_indices = @transform_9, window_bounds = array<i64: 1, 128>}]} {
    %c0 = arith.constant 0 : index
    %c0_0 = arith.constant 0 : index
    %0 = vector.load %arg1[%c0, %c0_0] : memref<128x16xf32, #tpu.memory_space<vmem>>, vector<128x16xf32>
    %1 = arith.truncf %0 : vector<128x16xf32> to vector<128x16xbf16>
    %c0_1 = arith.constant 0 : index
    %c0_2 = arith.constant 0 : index
    %2 = vector.load %arg2[%c0_1, %c0_2] : memref<128x4xf32, #tpu.memory_space<vmem>>, vector<128x4xf32>
    %3 = arith.truncf %2 : vector<128x4xf32> to vector<128x4xbf16>
    %c0_3 = arith.constant 0 : index
    %c0_4 = arith.constant 0 : index
    %4 = vector.load %arg3[%c0_3, %c0_4] : memref<16x32xbf16, #tpu.memory_space<vmem>>, vector<16x32xbf16>
    %cst = arith.constant dense<0.000000e+00> : vector<128x32xf32>
    %5 = tpu.matmul %1, %4, %cst {dimension_numbers = #tpu.dot_dimension_numbers<[1], [0], [0], [1], [0, 0, 1, 1], [], []>} : vector<128x16xbf16>, vector<16x32xbf16>, vector<128x32xf32> -> vector<128x32xf32>
    %c0_5 = arith.constant 0 : index
    %c0_6 = arith.constant 0 : index
    %6 = vector.load %arg4[%c0_5, %c0_6] : memref<1x32xf32, #tpu.memory_space<vmem>>, vector<1x32xf32>
    %7 = vector.broadcast %6 : vector<1x32xf32> to vector<128x32xf32>
    %8 = arith.addf %5, %7 : vector<128x32xf32>
    %cst_7 = arith.constant 0.000000e+00 : f32
    %9 = vector.broadcast %cst_7 : f32 to vector<128x32xf32>
    %10 = arith.maximumf %8, %9 : vector<128x32xf32>
    %11 = arith.truncf %10 : vector<128x32xf32> to vector<128x32xbf16>
    %c0_8 = arith.constant 0 : index
    %c0_9 = arith.constant 0 : index
    %12 = vector.load %arg5[%c0_8, %c0_9] : memref<32x32xbf16, #tpu.memory_space<vmem>>, vector<32x32xbf16>
    %cst_10 = arith.constant dense<0.000000e+00> : vector<128x32xf32>
    %13 = tpu.matmul %11, %12, %cst_10 {dimension_numbers = #tpu.dot_dimension_numbers<[1], [0], [0], [1], [0, 0, 1, 1], [], []>} : vector<128x32xbf16>, vector<32x32xbf16>, vector<128x32xf32> -> vector<128x32xf32>
    %c0_11 = arith.constant 0 : index
    %c0_12 = arith.constant 0 : index
    %14 = vector.load %arg6[%c0_11, %c0_12] : memref<4x32xbf16, #tpu.memory_space<vmem>>, vector<4x32xbf16>
    %cst_13 = arith.constant dense<0.000000e+00> : vector<128x32xf32>
    %15 = tpu.matmul %3, %14, %cst_13 {dimension_numbers = #tpu.dot_dimension_numbers<[1], [0], [0], [1], [0, 0, 1, 1], [], []>} : vector<128x4xbf16>, vector<4x32xbf16>, vector<128x32xf32> -> vector<128x32xf32>
    %16 = arith.addf %13, %15 : vector<128x32xf32>
    %c0_14 = arith.constant 0 : index
    %c0_15 = arith.constant 0 : index
    %17 = vector.load %arg7[%c0_14, %c0_15] : memref<1x32xf32, #tpu.memory_space<vmem>>, vector<1x32xf32>
    %18 = vector.broadcast %17 : vector<1x32xf32> to vector<128x32xf32>
    %19 = arith.addf %16, %18 : vector<128x32xf32>
    %cst_16 = arith.constant 0.000000e+00 : f32
    %20 = vector.broadcast %cst_16 : f32 to vector<128x32xf32>
    %21 = arith.maximumf %19, %20 : vector<128x32xf32>
    %c0_17 = arith.constant 0 : index
    %c0_18 = arith.constant 0 : index
    %22 = vector.load %arg8[%c0_17, %c0_18] : memref<1x32xf32, #tpu.memory_space<vmem>>, vector<1x32xf32>
    %cst_19 = arith.constant dense<0.000000e+00> : vector<1x128xf32>
    %23 = tpu.matmul %22, %21, %cst_19 {dimension_numbers = #tpu.dot_dimension_numbers<[1], [1], [0], [0], [0, 0, 1, 0], [], []>, precision = #tpu.contract_precision<fp32>} : vector<1x32xf32>, vector<128x32xf32>, vector<1x128xf32> -> vector<1x128xf32>
    %c0_20 = arith.constant 0 : index
    %c0_21 = arith.constant 0 : index
    %24 = memref.load %arg9[%c0_20, %c0_21] : memref<1x1xf32, #tpu.memory_space<smem>>
    %25 = vector.broadcast %24 : f32 to vector<1x128xf32>
    %26 = arith.addf %23, %25 : vector<1x128xf32>
    %c0_22 = arith.constant 0 : index
    %c0_23 = arith.constant 0 : index
    %27 = vector.load %arg10[%c0_22, %c0_23] : memref<1x128xf32, #tpu.memory_space<vmem>>, vector<1x128xf32>
    tpu.vector_store %arg10[%c0_22, %c0_23], %26 {strides = array<i32>} : memref<1x128xf32, #tpu.memory_space<vmem>>, vector<1x128xf32>,
    return
  }
  func.func @transform_0(%arg0: i32) -> (i32, i32) {
    %c0_i32 = arith.constant 0 : i32
    %c0_i32_0 = arith.constant 0 : i32
    return %arg0, %c0_i32 : i32, i32
  }
  func.func @transform_1(%arg0: i32) -> (i32, i32) {
    %c0_i32 = arith.constant 0 : i32
    %c0_i32_0 = arith.constant 0 : i32
    return %arg0, %c0_i32 : i32, i32
  }
  func.func @transform_2(%arg0: i32) -> (i32, i32) {
    %c0_i32 = arith.constant 0 : i32
    %c0_i32_0 = arith.constant 0 : i32
    %c0_i32_1 = arith.constant 0 : i32
    return %c0_i32, %c0_i32_0 : i32, i32
  }
  func.func @transform_3(%arg0: i32) -> (i32, i32) {
    %c0_i32 = arith.constant 0 : i32
    %c0_i32_0 = arith.constant 0 : i32
    %c0_i32_1 = arith.constant 0 : i32
    return %c0_i32, %c0_i32_0 : i32, i32
  }
  func.func @transform_4(%arg0: i32) -> (i32, i32) {
    %c0_i32 = arith.constant 0 : i32
    %c0_i32_0 = arith.constant 0 : i32
    %c0_i32_1 = arith.constant 0 : i32
    return %c0_i32, %c0_i32_0 : i32, i32
  }
  func.func @transform_5(%arg0: i32) -> (i32, i32) {
    %c0_i32 = arith.constant 0 : i32
    %c0_i32_0 = arith.constant 0 : i32
    %c0_i32_1 = arith.constant 0 : i32
    return %c0_i32, %c0_i32_0 : i32, i32
  }
  func.func @transform_6(%arg0: i32) -> (i32, i32) {
    %c0_i32 = arith.constant 0 : i32
    %c0_i32_0 = arith.constant 0 : i32
    %c0_i32_1 = arith.constant 0 : i32
    return %c0_i32, %c0_i32_0 : i32, i32
  }
  func.func @transform_7(%arg0: i32) -> (i32, i32) {
    %c0_i32 = arith.constant 0 : i32
    %c0_i32_0 = arith.constant 0 : i32
    %c0_i32_1 = arith.constant 0 : i32
    return %c0_i32, %c0_i32_0 : i32, i32
  }
  func.func @transform_8(%arg0: i32) -> (i32, i32) {
    %c0_i32 = arith.constant 0 : i32
    %c0_i32_0 = arith.constant 0 : i32
    %c0_i32_1 = arith.constant 0 : i32
    return %c0_i32, %c0_i32_0 : i32, i32
  }
  func.func @transform_9(%arg0: i32) -> (i32, i32) {
    %c0_i32 = arith.constant 0 : i32
    %c0_i32_0 = arith.constant 0 : i32
    return %c0_i32, %arg0 : i32, i32
  }
}

</mosaic_0001>

<bundles_post_ra>
// kernel: tpu_custom_call.1
= control target key start
LH: loop header
LB: loop body
LE: loop exit
PB: predicated region body
PF: predicated region fallthrough
CT: control target
= control target key end

     0   :  { %15 = vsyncpa [#allocation4], 0  ;;  %s1475_s0 = inlined_call_operand.hbm [shape: f32[8,16], index: 0, kind: input, shape index: {}]   ;;  %s1476_s1 = inlined_call_operand.vmem [shape: f32[8,4], index: 1, kind: input, shape index: {}]   ;;  %s1477_s2 = inlined_call_operand.hbm [shape: bf16[16,32], index: 2, kind: input, shape index: {}]   ;;  %s1478_s3 = inlined_call_operand.hbm [shape: f32[1,32], index: 3, kind: input, shape index: {}]   ;;  %s1479_s4 = inlined_call_operand.vmem [shape: bf16[32,32], index: 4, kind: input, shape index: {}]   ;;  %s1480_s5 = inlined_call_operand.vmem [shape: bf16[4,32], index: 5, kind: input, shape index: {}]   ;;  %s1481_s6 = inlined_call_operand.vmem [shape: f32[1,32], index: 6, kind: input, shape index: {}]   ;;  %s1482_s7 = inlined_call_operand.vmem [shape: f32[1,32], index: 7, kind: input, shape index: {}]   ;;  %s1483_s8 = inlined_call_operand.<no memory space> [shape: f32[1,1], index: 8, kind: input, shape index: {}]   ;;  %s1484_s9 = inlined_call_operand.hbm [shape: f32[1,8], index: 9, kind: output, shape index: {}]  }
   0x1   :  { %16 = vsyncpa [#allocation7], 0 }
   0x2   :  { %17 = vsyncpa [#allocation5], 0  ;;  %s37_s11 = sshll.u32 %s1477_s2, 4  ;;  %s38_s11 = int_to_ptr.hbm [resolvable:$true] %s37_s11 }
   0x3   :  { %21 = vsyncadd [#allocation4], 1920  ;;  %s1008_s12 = smov [#allocation6]   ;;  %s22_s16 = sshll.u32 %s1475_s0, 4  ;;  %s23_s16 = int_to_ptr.hbm [resolvable:$true] %s22_s16 }
   0x4   :  { %s39_s13 = sshll.u32 %s1008_s12, 4  ;;  %s1009_s17 = smov 64   ;;  %s40_s13 = int_to_ptr.vmem [resolvable:$true] %s39_s13 }
   0x5   :  { %s1010_s18 = smov 4   ;;  %s1011_s19 = smov [#allocation3]  }
   0x6   :  { %45 = dma.hbm_to_vmem [thread:$0]  %s38_s11, 128, %s40_s13, [#allocation7], %s1009_s17, %s1009_s17, %s1010_s18  }
   0x7   :  { %s24_s20 = sshll.u32 %s1011_s19, 4  ;;  %s1012_s21 = smov 128   ;;  %s25_s20 = int_to_ptr.vmem [resolvable:$true] %s24_s20 }
   0x8   :  { %s1013_s22 = smov 8   ;;  %s51_s24 = sshll.u32 %s1478_s3, 4  ;;  %s52_s24 = int_to_ptr.hbm [resolvable:$true] %s51_s24 }
   0x9   :  { %30 = dma.hbm_to_vmem [thread:$0]  %s23_s16, 128, %s25_s20, [#allocation4], %s1012_s21, %s1012_s21, %s1013_s22  }
   0xa   :  { %s1014_s25 = smov [#allocation8]  }
   0xb   :  { %s53_s26 = sshll.u32 %s1014_s25, 4  ;;  %s54_s26 = int_to_ptr.vmem [resolvable:$true] %s53_s26 }
   0xc   :  { %56 = dma.hbm_to_vmem [thread:$0]  %s52_s24, 16, %s54_s26, [#allocation7]  }
   0xd   :  { %1002 = dma.done.wait [#allocation4], 2048  }
   0xe   :  { %1003 = vsyncadd [#allocation4], 4294965248 }
   0xf   :  { %1004 = dma.done.wait [#allocation7], 144  }
  0x10   :  { %1005 = vsyncadd [#allocation7], 4294967152  ;;  %v893_v0 = vld [vmem:[#allocation6] sm:$0xff]  ;;  %v81_v2 = vld [vmem:[#allocation3 + $0x8] sm:$0xff]  ;;  %vm140_vm0 = vcmask 130048   ;;  %vm268_vm1 = vcmask 1041408  }
  0x11   :  { %v80_v1 = vld [vmem:[#allocation3] sm:$0xff]  ;;  %172 = vmatpush.bf16.msra.mxu0 %v893_v0  ;;  %v82_v4 = vld [vmem:[#allocation3 + $0x10] sm:$0xff]  ;;  %v83_v5 = vld [vmem:[#allocation3 + $0x18] sm:$0xff]  ;;  %vm243_vm2 = vcmask 31744   ;;  %vm333_vm3 = vcmask 261120   ;;  %s1015_s17 = smov [#allocation9]  }
  0x12   :  { %v96_v3 = vpack.c.bf16 %v81_v2, %v80_v1  ;;  %v97_v6 = vpack.c.bf16 %v83_v5, %v82_v4  ;;  %v84_v7 = vld [vmem:[#allocation3 + $0x20] sm:$0xff]  ;;  %v85_v8 = vld [vmem:[#allocation3 + $0x28] sm:$0xff]  ;;  %v86_v10 = vld [vmem:[#allocation3 + $0x30] sm:$0xff]  ;;  %s844_s18 = sshll.u32 %s1015_s17, 4  ;;  %s846_s21 = sshll.u32 %s1484_s9, 4  ;;  %s845_s18 = int_to_ptr.vmem [resolvable:$true] %s844_s18  ;;  %s847_s21 = int_to_ptr.hbm [resolvable:$true] %s846_s21 }
  0x13   :  { %v98_v9 = vpack.c.bf16 %v85_v8, %v84_v7  ;;  %v87_v11 = vld [vmem:[#allocation3 + $0x38] sm:$0xff]  ;;  %v88_v13 = vld [vmem:[#allocation3 + $0x40] sm:$0xff]  ;;  %v89_v14 = vld [vmem:[#allocation3 + $0x48] sm:$0xff] }
  0x14   :  { %861 = vmatmul.msk.bf16.vlgmr.msra.gmra.mxu0 %vm140_vm0, %v96_v3  ;;  %v99_v12 = vpack.c.bf16 %v87_v11, %v86_v10  ;;  %v100_v15 = vpack.c.bf16 %v89_v14, %v88_v13  ;;  %v90_v16 = vld [vmem:[#allocation3 + $0x50] sm:$0xff]  ;;  %v91_v17 = vld [vmem:[#allocation3 + $0x58] sm:$0xff]  ;;  %v92_v19 = vld [vmem:[#allocation3 + $0x60] sm:$0xff] }
  0x15   :  { %v101_v18 = vpack.c.bf16 %v91_v17, %v90_v16  ;;  %v93_v20 = vld [vmem:[#allocation3 + $0x68] sm:$0xff]  ;;  %v242_v23 = vld [vmem:[%s1480_s5] sm:$0x3]  ;;  %v94_v29 = vld [vmem:[#allocation3 + $0x70] sm:$0xff] }
  0x16   :  { %v102_v21 = vpack.c.bf16 %v93_v20, %v92_v19  ;;  %v895_v22 = vld [vmem:[%s1479_s4 + $0x8] sm:$0xff]  ;;  %v270_v24 = vsel %vm268_vm1, %v242_v23, 0  ;;  %v894_v25 = vld [vmem:[%s1479_s4] sm:$0xff]  ;;  %v95_v30 = vld [vmem:[#allocation3 + $0x78] sm:$0xff] }
  0x17   :  { %364 = vmatpush.bf16.msra.mxu2 %v895_v22  ;;  %279 = vmatpush.bf16.msra.mxu1 %v270_v24  ;;  %v104_v26 = vld [vmem:[%s1476_s1] sm:$0xff]  ;;  %v105_v27 = vld [vmem:[%s1476_s1 + $0x8] sm:$0xff]  ;;  %v103_v31 = vpack.c.bf16 %v95_v30, %v94_v29  ;;  %v106_v32 = vld [vmem:[%s1476_s1 + $0x10] sm:$0xff] }
  0x18   :  { %v120_v28 = vpack.c.bf16 %v105_v27, %v104_v26  ;;  %v107_v33 = vld [vmem:[%s1476_s1 + $0x18] sm:$0xff]  ;;  %v1106_v36 = vld [vmem:[#allocation8] ss:$0 sm:$0xff]  ;;  %v108_v40 = vld [vmem:[%s1476_s1 + $0x20] sm:$0xff] }
  0x19   :  { %v121_v34 = vpack.c.bf16 %v107_v33, %v106_v32  ;;  %v109_v41 = vld [vmem:[%s1476_s1 + $0x28] sm:$0xff]  ;;  %v110_v50 = vld [vmem:[%s1476_s1 + $0x30] sm:$0xff]  ;;  %v111_v51 = vld [vmem:[%s1476_s1 + $0x38] sm:$0xff] }
  0x1a   :  { %869 = vmatmul.msk.bf16.vlgmr.msra.gmra.mxu1 %vm243_vm2, %v120_v28  ;;  %v122_v44 = vpack.c.bf16 %v109_v41, %v108_v40  ;;  %v123_v54 = vpack.c.bf16 %v111_v51, %v110_v50  ;;  %v112_v60 = vld [vmem:[%s1476_s1 + $0x40] sm:$0xff]  ;;  %v113_v61 = vld [vmem:[%s1476_s1 + $0x48] sm:$0xff]  ;;  %v115_v7 = vld [vmem:[%s1476_s1 + $0x58] sm:$0xff] }
  0x1b   :  { %365 = vmatpush.bf16.msra.mxu2 %v894_v25  ;;  %v124_v0 = vpack.c.bf16 %v113_v61, %v112_v60  ;;  %v116_v16 = vld [vmem:[%s1476_s1 + $0x60] sm:$0xff]  ;;  %v117_v17 = vld [vmem:[%s1476_s1 + $0x68] sm:$0xff]  ;;  %v118_v26 = vld [vmem:[%s1476_s1 + $0x70] sm:$0xff] }
  0x1c   :  { %v126_v20 = vpack.c.bf16 %v117_v17, %v116_v16  ;;  %v119_v27 = vld [vmem:[%s1476_s1 + $0x78] sm:$0xff] }
  0x1d   :  { %v127_v30 = vpack.c.bf16 %v119_v27, %v118_v26 }
  0x24   :  { %862 = vmatmul.msk.bf16.gmra.mxu0 %vm140_vm0, %v97_v6  ;;  %v114_v6 = vld [vmem:[%s1476_s1 + $0x50] sm:$0xff] }
  0x25   :  { %v125_v10 = vpack.c.bf16 %v115_v7, %v114_v6 }
  0x2a   :  { %870 = vmatmul.msk.bf16.gmra.mxu1 %vm243_vm2, %v121_v34 }
  0x34   :  { %863 = vmatmul.msk.bf16.gmra.mxu0 %vm140_vm0, %v98_v9 }
  0x3a   :  { %871 = vmatmul.msk.bf16.gmra.mxu1 %vm243_vm2, %v122_v44 }
  0x44   :  { %864 = vmatmul.msk.bf16.gmra.mxu0 %vm140_vm0, %v99_v12 }
  0x4a   :  { %872 = vmatmul.msk.bf16.gmra.mxu1 %vm243_vm2, %v123_v54 }
  0x54   :  { %865 = vmatmul.msk.bf16.gmra.mxu0 %vm140_vm0, %v100_v15 }
  0x5a   :  { %873 = vmatmul.msk.bf16.gmra.mxu1 %vm243_vm2, %v124_v0 }
  0x64   :  { %866 = vmatmul.msk.bf16.gmra.mxu0 %vm140_vm0, %v101_v18 }
  0x6a   :  { %874 = vmatmul.msk.bf16.gmra.mxu1 %vm243_vm2, %v125_v10 }
  0x74   :  { %867 = vmatmul.msk.bf16.gmra.mxu0 %vm140_vm0, %v102_v21 }
  0x7a   :  { %875 = vmatmul.msk.bf16.gmra.mxu1 %vm243_vm2, %v126_v20 }
  0x84   :  { %868 = vmatmul.msk.bf16.gmra.mxu0 %vm140_vm0, %v103_v31 }
  0x8a   :  { %876 = vmatmul.msk.bf16.gmra.mxu1 %vm243_vm2, %v127_v30 }
  0x91   :  { %v174_v35 = vpop.f32.mrf.mxu0 }
  0x92   :  { %v175_v37 = vadd.f32 %v1106_v36, %v174_v35 }
  0x94   :  { %v214_v42 = vmax.f32 %v175_v37, 0.0 }
  0x97   :  { %v281_v41 = vpop.f32.mrf.mxu1 }
  0x99   :  { %v176_v38 = vpop.f32.mrf.mxu0 }
  0x9a   :  { %v177_v39 = vadd.f32 %v1106_v36, %v176_v38 }
  0x9c   :  { %v215_v43 = vmax.f32 %v177_v39, 0.0 }
  0x9e   :  { %v230_v45 = vpack.c.bf16 %v215_v43, %v214_v42 }
  0xa0   :  { %885 = vmatmul.msk.bf16.vlgmr.msra.gmra.mxu2 %vm333_vm3, %v230_v45 }
  0xa1   :  { %v179_v46 = vpop.f32.mrf.mxu0 }
  0xa2   :  { %v180_v47 = vadd.f32 %v1106_v36, %v179_v46 }
  0xa4   :  { %v216_v52 = vmax.f32 %v180_v47, 0.0 }
  0xa9   :  { %v181_v48 = vpop.f32.mrf.mxu0 }
  0xaa   :  { %v182_v49 = vadd.f32 %v1106_v36, %v181_v48  ;;  %v283_v48 = vpop.f32.mrf.mxu1 }
  0xac   :  { %v217_v53 = vmax.f32 %v182_v49, 0.0 }
  0xae   :  { %v231_v55 = vpack.c.bf16 %v217_v53, %v216_v52 }
  0xb0   :  { %886 = vmatmul.msk.bf16.gmra.mxu2 %vm333_vm3, %v231_v55 }
  0xb1   :  { %v184_v56 = vpop.f32.mrf.mxu0 }
  0xb2   :  { %v185_v57 = vadd.f32 %v1106_v36, %v184_v56  ;;  %v286_v49 = vpop.f32.mrf.mxu1 }
  0xb4   :  { %v218_v62 = vmax.f32 %v185_v57, 0.0 }
  0xb9   :  { %v186_v58 = vpop.f32.mrf.mxu0 }
  0xba   :  { %v187_v59 = vadd.f32 %v1106_v36, %v186_v58  ;;  %v288_v51 = vpop.f32.mrf.mxu1 }
  0xbc   :  { %v219_v63 = vmax.f32 %v187_v59, 0.0 }
  0xbe   :  { %v232_v1 = vpack.c.bf16 %v219_v63, %v218_v62 }
  0xc0   :  { %887 = vmatmul.msk.bf16.gmra.mxu2 %vm333_vm3, %v232_v1 }
  0xc1   :  { %v189_v2 = vpop.f32.mrf.mxu0 }
  0xc2   :  { %v190_v3 = vadd.f32 %v1106_v36, %v189_v2  ;;  %v291_v55 = vpop.f32.mrf.mxu1 }
  0xc4   :  { %v220_v8 = vmax.f32 %v190_v3, 0.0 }
  0xc9   :  { %v191_v4 = vpop.f32.mrf.mxu0 }
  0xca   :  { %v192_v5 = vadd.f32 %v1106_v36, %v191_v4  ;;  %v293_v58 = vpop.f32.mrf.mxu1 }
  0xcc   :  { %v221_v9 = vmax.f32 %v192_v5, 0.0 }
  0xce   :  { %v233_v11 = vpack.c.bf16 %v221_v9, %v220_v8 }
  0xd0   :  { %888 = vmatmul.msk.bf16.gmra.mxu2 %vm333_vm3, %v233_v11 }
  0xd1   :  { %v194_v12 = vpop.f32.mrf.mxu0 }
  0xd2   :  { %v195_v13 = vadd.f32 %v1106_v36, %v194_v12  ;;  %v296_v60 = vpop.f32.mrf.mxu1 }
  0xd4   :  { %v222_v18 = vmax.f32 %v195_v13, 0.0 }
  0xd9   :  { %v196_v14 = vpop.f32.mrf.mxu0 }
  0xda   :  { %v197_v15 = vadd.f32 %v1106_v36, %v196_v14  ;;  %v298_v0 = vpop.f32.mrf.mxu1 }
  0xdc   :  { %v223_v19 = vmax.f32 %v197_v15, 0.0 }
  0xde   :  { %v234_v21 = vpack.c.bf16 %v223_v19, %v222_v18 }
  0xe0   :  { %889 = vmatmul.msk.bf16.gmra.mxu2 %vm333_vm3, %v234_v21 }
  0xe1   :  { %v199_v22 = vpop.f32.mrf.mxu0 }
  0xe2   :  { %v200_v23 = vadd.f32 %v1106_v36, %v199_v22  ;;  %v301_v4 = vpop.f32.mrf.mxu1 }
  0xe4   :  { %v224_v28 = vmax.f32 %v200_v23, 0.0  ;;  %v1195_v23 = vld [vmem:[%s1481_s6] ss:$0 sm:$0xff] }
  0xe9   :  { %v201_v24 = vpop.f32.mrf.mxu0 }
  0xea   :  { %v202_v25 = vadd.f32 %v1106_v36, %v201_v24  ;;  %v303_v7 = vpop.f32.mrf.mxu1 }
  0xec   :  { %v225_v29 = vmax.f32 %v202_v25, 0.0 }
  0xee   :  { %v235_v31 = vpack.c.bf16 %v225_v29, %v224_v28 }
  0xf0   :  { %890 = vmatmul.msk.bf16.gmra.mxu2 %vm333_vm3, %v235_v31 }
  0xf1   :  { %v204_v32 = vpop.f32.mrf.mxu0 }
  0xf2   :  { %v205_v33 = vadd.f32 %v1106_v36, %v204_v32  ;;  %v306_v10 = vpop.f32.mrf.mxu1 }
  0xf4   :  { %v226_v37 = vmax.f32 %v205_v33, 0.0 }
  0xf9   :  { %v206_v34 = vpop.f32.mrf.mxu0 }
  0xfa   :  { %v207_v35 = vadd.f32 %v1106_v36, %v206_v34  ;;  %v308_v13 = vpop.f32.mrf.mxu1 }
  0xfc   :  { %v227_v38 = vmax.f32 %v207_v35, 0.0 }
  0xfe   :  { %v236_v39 = vpack.c.bf16 %v227_v38, %v226_v37 }
 0x100   :  { %891 = vmatmul.msk.bf16.gmra.mxu2 %vm333_vm3, %v236_v39 }
 0x101   :  { %v209_v40 = vpop.f32.mrf.mxu0 }
 0x102   :  { %v210_v42 = vadd.f32 %v1106_v36, %v209_v40  ;;  %v311_v16 = vpop.f32.mrf.mxu1 }
 0x104   :  { %v228_v45 = vmax.f32 %v210_v42, 0.0 }
 0x109   :  { %v211_v43 = vpop.f32.mrf.mxu0 }
 0x10a   :  { %v212_v44 = vadd.f32 %v1106_v36, %v211_v43  ;;  %v313_v18 = vpop.f32.mrf.mxu1 }
 0x10c   :  { %v229_v46 = vmax.f32 %v212_v44, 0.0 }
 0x10e   :  { %v237_v47 = vpack.c.bf16 %v229_v46, %v228_v45 }
 0x110   :  { %892 = vmatmul.msk.bf16.gmra.mxu2 %vm333_vm3, %v237_v47 }
 0x112   :  { %v316_v20 = vpop.f32.mrf.mxu1 }
 0x11a   :  { %v318_v26 = vpop.f32.mrf.mxu1 }
 0x123   :  { %v367_v50 = vpop.f32.mrf.mxu2 }
 0x124   :  { %v1174_v52 = vadd.f32 %v367_v50, %v281_v41 }
 0x12b   :  { %v369_v53 = vpop.f32.mrf.mxu2 }
 0x12c   :  { %v1176_v54 = vadd.f32 %v369_v53, %v283_v48 }
 0x133   :  { %v372_v56 = vpop.f32.mrf.mxu2 }
 0x134   :  { %v1178_v57 = vadd.f32 %v372_v56, %v286_v49 }
 0x13b   :  { %v374_v36 = vpop.f32.mrf.mxu2 }
 0x13c   :  { %v1180_v59 = vadd.f32 %v374_v36, %v288_v51 }
 0x143   :  { %v377_v61 = vpop.f32.mrf.mxu2 }
 0x144   :  { %v1182_v62 = vadd.f32 %v377_v61, %v291_v55 }
 0x14b   :  { %v379_v63 = vpop.f32.mrf.mxu2 }
 0x14c   :  { %v1184_v1 = vadd.f32 %v379_v63, %v293_v58 }
 0x153   :  { %v382_v2 = vpop.f32.mrf.mxu2 }
 0x154   :  { %v1186_v3 = vadd.f32 %v382_v2, %v296_v60 }
 0x15b   :  { %v384_v5 = vpop.f32.mrf.mxu2 }
 0x15c   :  { %v1188_v6 = vadd.f32 %v384_v5, %v298_v0 }
 0x163   :  { %v387_v8 = vpop.f32.mrf.mxu2 }
 0x164   :  { %v1190_v9 = vadd.f32 %v387_v8, %v301_v4 }
 0x166   :  { %v419_v4 = vadd.f32 %v1195_v23, %v1190_v9  ;;  %v418_v9 = vadd.f32 %v1195_v23, %v1188_v6  ;;  %v417_v6 = vadd.f32 %v1195_v23, %v1186_v3  ;;  %v416_v3 = vadd.f32 %v1195_v23, %v1184_v1 }
 0x167   :  { %v415_v1 = vadd.f32 %v1195_v23, %v1182_v62  ;;  %v414_v62 = vadd.f32 %v1195_v23, %v1180_v59  ;;  %v413_v59 = vadd.f32 %v1195_v23, %v1178_v57  ;;  %v412_v57 = vadd.f32 %v1195_v23, %v1176_v54 }
 0x168   :  { %v411_v54 = vadd.f32 %v1195_v23, %v1174_v52 }
 0x16a   :  { %v427_v52 = vmax.f32 %v411_v54, 0.0 }
 0x16b   :  { %v389_v11 = vpop.f32.mrf.mxu2 }
 0x16c   :  { %v390_v12 = vadd.f32 %v389_v11, %v303_v7 }
 0x16e   :  { %v420_v36 = vadd.f32 %v1195_v23, %v390_v12  ;;  %v435_v12 = vmax.f32 %v419_v4, 0.0 }
 0x170   :  { %v436_v5 = vmax.f32 %v420_v36, 0.0 }
 0x173   :  { %v392_v14 = vpop.f32.mrf.mxu2 }
 0x174   :  { %v393_v41 = vadd.f32 %v392_v14, %v306_v10 }
 0x176   :  { %v421_v50 = vadd.f32 %v1195_v23, %v393_v41 }
 0x178   :  { %v437_v60 = vmax.f32 %v421_v50, 0.0  ;;  %v429_v50 = vmax.f32 %v413_v59, 0.0 }
 0x17a   :  { %v480_v7 = vsel %vm333_vm3, %v437_v60, 0  ;;  %v456_v4 = vsel %vm333_vm3, %v429_v50, 0 }
 0x17b   :  { %v394_v15 = vpop.f32.mrf.mxu2  ;;  %v1255_v8 = vand.u32 4294901760, %v480_v7 }
 0x17c   :  { %v395_v34 = vadd.f32 %v394_v15, %v308_v13  ;;  %v477_v13 = vsel %vm333_vm3, %v436_v5, 0  ;;  %v1367_v5 = vand.u32 4294901760, %v456_v4 }
 0x17d   :  { %v1269_v14 = vand.u32 4294901760, %v477_v13 }
 0x17e   :  { %v422_v43 = vadd.f32 %v1195_v23, %v395_v34 }
 0x180   :  { %v438_v51 = vmax.f32 %v422_v43, 0.0 }
 0x182   :  { %v483_v61 = vsel %vm333_vm3, %v438_v51, 0 }
 0x183   :  { %v397_v17 = vpop.f32.mrf.mxu2  ;;  %v1241_v63 = vand.u32 4294901760, %v483_v61 }
 0x184   :  { %v398_v29 = vadd.f32 %v397_v17, %v311_v16  ;;  %v1273_v16 = vsub.f32 %v480_v7, %v1255_v8  ;;  %v434_v17 = vmax.f32 %v418_v9, 0.0 }
 0x185   :  { %v1259_v11 = vsub.f32 %v483_v61, %v1241_v63  ;;  %v428_v61 = vmax.f32 %v412_v57, 0.0 }
 0x186   :  { %v423_v35 = vadd.f32 %v1195_v23, %v398_v29 }
 0x187   :  { %v564_v15 = vand.u32 4294901760, %v1259_v11 }
 0x188   :  { %v439_v44 = vmax.f32 %v423_v35, 0.0 }
 0x189   :  { %v565_v59 = vsub.f32 %v1259_v11, %v564_v15 }
 0x18a   :  { %v486_v53 = vsel %vm333_vm3, %v439_v44, 0 }
 0x18b   :  { %v399_v19 = vpop.f32.mrf.mxu2  ;;  %v1228_v55 = vand.u32 4294901760, %v486_v53 }
 0x18c   :  { %v400_v24 = vadd.f32 %v399_v19, %v313_v18  ;;  %v474_v18 = vsel %vm333_vm3, %v435_v12, 0 }
 0x18d   :  { %v1245_v2 = vsub.f32 %v486_v53, %v1228_v55  ;;  %v1283_v19 = vand.u32 4294901760, %v474_v18 }
 0x18e   :  { %v424_v30 = vadd.f32 %v1195_v23, %v400_v24  ;;  %v471_v24 = vsel %vm333_vm3, %v434_v17, 0  ;;  %v450_v17 = vsel %vm333_vm3, %v427_v52, 0 }
 0x18f   :  { %v558_v10 = vand.u32 4294901760, %v1245_v2 }
 0x190   :  { %v440_v37 = vmax.f32 %v424_v30, 0.0 }
 0x192   :  { %v489_v45 = vsel %vm333_vm3, %v440_v37, 0 }
 0x193   :  { %v402_v21 = vpop.f32.mrf.mxu2  ;;  %v1216_v48 = vand.u32 4294901760, %v489_v45 }
 0x194   :  { %v403_v22 = vadd.f32 %v402_v21, %v316_v20  ;;  %v570_v20 = vand.u32 4294901760, %v1273_v16  ;;  %v1287_v21 = vsub.f32 %v477_v13, %v1269_v14 }
 0x195   :  { %v1232_v58 = vsub.f32 %v489_v45, %v1216_v48 }
 0x196   :  { %v425_v25 = vadd.f32 %v1195_v23, %v403_v22  ;;  %v433_v22 = vmax.f32 %v417_v6, 0.0  ;;  %v1383_v6 = vsub.f32 %v456_v4, %v1367_v5 }
 0x197   :  { %v552_v0 = vand.u32 4294901760, %v1232_v58 }
 0x198   :  { %v441_v31 = vmax.f32 %v425_v25, 0.0  ;;  %v1297_v25 = vand.u32 4294901760, %v471_v24  ;;  %v468_v29 = vsel %vm333_vm3, %v433_v22, 0 }
 0x199   :  { %v1311_v30 = vand.u32 4294901760, %v468_v29 }
 0x19a   :  { %v492_v38 = vsel %vm333_vm3, %v441_v31, 0 }
 0x19b   :  { %v404_v27 = vpop.f32.mrf.mxu2  ;;  %v1205_v42 = vand.u32 4294901760, %v492_v38 }
 0x19c   :  { %v405_v28 = vadd.f32 %v404_v27, %v318_v26  ;;  %v576_v26 = vand.u32 4294901760, %v1287_v21  ;;  %v1301_v27 = vsub.f32 %v474_v18, %v1283_v19  ;;  %v1391_v18 = vand.u32 4294901760, %v450_v17 }
 0x19d   :  { %v1219_v49 = vsub.f32 %v492_v38, %v1205_v42  ;;  %v1329_v38 = vsub.f32 %v468_v29, %v1311_v30 }
 0x19e   :  { %v426_v32 = vadd.f32 %v1195_v23, %v405_v28  ;;  %v432_v28 = vmax.f32 %v416_v3, 0.0  ;;  %v582_v31 = vand.u32 4294901760, %v1301_v27  ;;  %v453_v23 = vsel %vm333_vm3, %v428_v61, 0 }
 0x19f   :  { %v546_v56 = vand.u32 4294901760, %v1219_v49  ;;  %v594_v44 = vand.u32 4294901760, %v1329_v38  ;;  %v1379_v12 = vand.u32 4294901760, %v453_v23  ;;  %v618_v3 = vand.u32 4294901760, %v1383_v6 }
 0x1a0   :  { %v442_v33 = vmax.f32 %v426_v32, 0.0  ;;  %v1315_v32 = vsub.f32 %v471_v24, %v1297_v25  ;;  %v465_v34 = vsel %vm333_vm3, %v432_v28, 0  ;;  %v629_v29 = vsub.f32 %v450_v17, %v1391_v18 }
 0x1a1   :  { %v1325_v35 = vand.u32 4294901760, %v465_v34  ;;  %v1395_v22 = vsub.f32 %v453_v23, %v1379_v12  ;;  %v583_v54 = vsub.f32 %v1301_v27, %v582_v31 }
 0x1a2   :  { %v495_v39 = vsel %vm333_vm3, %v442_v33, 0  ;;  %v431_v33 = vmax.f32 %v415_v1, 0.0  ;;  %v588_v37 = vand.u32 4294901760, %v1315_v32 }
 0x1a3   :  { %v1203_v40 = vand.u32 4294901760, %v495_v39  ;;  %v1343_v45 = vsub.f32 %v465_v34, %v1325_v35  ;;  %v624_v1 = vand.u32 4294901760, %v1395_v22 }
 0x1a4   :  { %v462_v41 = vsel %vm333_vm3, %v431_v33, 0  ;;  %v553_v33 = vsub.f32 %v1232_v58, %v552_v0  ;;  %v589_v61 = vsub.f32 %v1315_v32, %v588_v37 }
 0x1a5   :  { %498 = vmatpush.xpose.msra.mxu3 %v1203_v40  ;;  %694 = vmatpush.xpose.msrb.mxu1 %v1203_v40  ;;  %v1212_v46 = vsub.f32 %v495_v39, %v1203_v40  ;;  %v430_v39 = vmax.f32 %v414_v62, 0.0  ;;  %v1339_v43 = vand.u32 4294901760, %v462_v41  ;;  %v600_v36 = vand.u32 4294901760, %v1343_v45 }
 0x1a6   :  { %v547_v62 = vsub.f32 %v1219_v49, %v546_v56  ;;  %v554_v34 = vand.u32 4294901760, %v553_v33 }
 0x1a7   :  { %641 = vmatpush.xpose.msrb.mxu0 %v1212_v46  ;;  %v540_v47 = vand.u32 4294901760, %v1212_v46  ;;  %v459_v51 = vsel %vm333_vm3, %v430_v39, 0  ;;  %v1357_v60 = vsub.f32 %v462_v41, %v1339_v43  ;;  %v443_v39 = vld [vmem:[%s1482_s7] sm:$0x1]  ;;  %v571_v41 = vsub.f32 %v1273_v16, %v570_v20 }
 0x1a8   :  { %v1353_v53 = vand.u32 4294901760, %v459_v51 }
 0x1a9   :  { %500 = vmatpush.xpose.msra.mxu3 %v1205_v42  ;;  %696 = vmatpush.xpose.msrb.mxu1 %v1205_v42  ;;  %v606_v7 = vand.u32 4294901760, %v1357_v60  ;;  %v541_v24 = vsub.f32 %v1212_v46, %v540_v47  ;;  %v630_v46 = vand.u32 4294901760, %v629_v29 }
 0x1aa   :  { %735 = vmatpush.xpose.msrb.mxu2 %v540_v47  ;;  %v1371_v9 = vsub.f32 %v459_v51, %v1353_v53  ;;  %v548_v47 = vand.u32 4294901760, %v547_v62 }
 0x1ab   :  { %644 = vmatpush.xpose.msrb.mxu0 %v1219_v49  ;;  %v542_v28 = vand.u32 4294901760, %v541_v24  ;;  %v559_v49 = vsub.f32 %v1245_v2, %v558_v10  ;;  %v607_v52 = vsub.f32 %v1357_v60, %v606_v7  ;;  %v631_v17 = vsub.f32 %v629_v29, %v630_v46 }
 0x1ac   :  { %v612_v13 = vand.u32 4294901760, %v1371_v9 }
 0x1ad   :  { %502 = vmatpush.xpose.msra.mxu3 %v1216_v48  ;;  %698 = vmatpush.xpose.msrb.mxu1 %v1216_v48 }
 0x1ae   :  { %739 = vmatpush.xpose.msrb.mxu2 %v546_v56  ;;  %v560_v56 = vand.u32 4294901760, %v559_v49 }
 0x1af   :  { %647 = vmatpush.xpose.msrb.mxu0 %v1232_v58  ;;  %v447_v58 = vsel %vm333_vm3, %v443_v39, 0 }
 0x1b0   :  { %v529_v57 = vand.u32 4294901760, %v447_v58 }
 0x1b1   :  { %504 = vmatpush.xpose.msra.mxu3 %v1228_v55  ;;  %700 = vmatpush.xpose.msrb.mxu1 %v1228_v55 }
 0x1b2   :  { %743 = vmatpush.xpose.msrb.mxu2 %v552_v0  ;;  %v566_v0 = vand.u32 4294901760, %v565_v59 }
 0x1b3   :  { %650 = vmatpush.xpose.msrb.mxu0 %v1245_v2  ;;  %v530_v2 = vsub.f32 %v447_v58, %v529_v57 }
 0x1b5   :  { %506 = vmatpush.xpose.msra.mxu3 %v1241_v63  ;;  %702 = vmatpush.xpose.msrb.mxu1 %v1241_v63 }
 0x1b6   :  { %747 = vmatpush.xpose.msrb.mxu2 %v558_v10  ;;  %v572_v10 = vand.u32 4294901760, %v571_v41 }
 0x1b7   :  { %653 = vmatpush.xpose.msrb.mxu0 %v1259_v11  ;;  %v577_v11 = vsub.f32 %v1287_v21, %v576_v26 }
 0x1b9   :  { %508 = vmatpush.xpose.msra.mxu3 %v1255_v8  ;;  %704 = vmatpush.xpose.msrb.mxu1 %v1255_v8  ;;  %v578_v51 = vand.u32 4294901760, %v577_v11 }
 0x1ba   :  { %751 = vmatpush.xpose.msrb.mxu2 %v564_v15  ;;  %v531_v15 = vand.u32 4294901760, %v530_v2 }
 0x1bb   :  { %656 = vmatpush.xpose.msrb.mxu0 %v1273_v16 }
 0x1bc   :  { %v532_v50 = vsub.f32 %v530_v2, %v531_v15 }
 0x1bd   :  { %510 = vmatpush.xpose.msra.mxu3 %v1269_v14  ;;  %706 = vmatpush.xpose.msrb.mxu1 %v1269_v14 }
 0x1be   :  { %755 = vmatpush.xpose.msrb.mxu2 %v570_v20  ;;  %v533_v16 = vand.u32 4294901760, %v532_v50  ;;  %v584_v20 = vand.u32 4294901760, %v583_v54 }
 0x1bf   :  { %659 = vmatpush.xpose.msrb.mxu0 %v1287_v21  ;;  %v590_v21 = vand.u32 4294901760, %v589_v61 }
 0x1c1   :  { %512 = vmatpush.xpose.msra.mxu3 %v1283_v19  ;;  %708 = vmatpush.xpose.msrb.mxu1 %v1283_v19 }
 0x1c2   :  { %759 = vmatpush.xpose.msrb.mxu2 %v576_v26  ;;  %v595_v26 = vsub.f32 %v1329_v38, %v594_v44 }
 0x1c3   :  { %662 = vmatpush.xpose.msrb.mxu0 %v1301_v27  ;;  %v601_v27 = vsub.f32 %v1343_v45, %v600_v36 }
 0x1c4   :  { %v596_v4 = vand.u32 4294901760, %v595_v26 }
 0x1c5   :  { %514 = vmatpush.xpose.msra.mxu3 %v1297_v25  ;;  %710 = vmatpush.xpose.msrb.mxu1 %v1297_v25 }
 0x1c6   :  { %763 = vmatpush.xpose.msrb.mxu2 %v582_v31  ;;  %v602_v31 = vand.u32 4294901760, %v601_v27 }
 0x1c7   :  { %665 = vmatpush.xpose.msrb.mxu0 %v1315_v32  ;;  %v608_v32 = vand.u32 4294901760, %v607_v52 }
 0x1c9   :  { %516 = vmatpush.xpose.msra.mxu3 %v1311_v30  ;;  %712 = vmatpush.xpose.msrb.mxu1 %v1311_v30 }
 0x1ca   :  { %767 = vmatpush.xpose.msrb.mxu2 %v588_v37  ;;  %v613_v37 = vsub.f32 %v1371_v9, %v612_v13 }
 0x1cb   :  { %668 = vmatpush.xpose.msrb.mxu0 %v1329_v38 }
 0x1cc   :  { %v614_v38 = vand.u32 4294901760, %v613_v37 }
 0x1cd   :  { %518 = vmatpush.xpose.msra.mxu3 %v1325_v35  ;;  %714 = vmatpush.xpose.msrb.mxu1 %v1325_v35 }
 0x1ce   :  { %771 = vmatpush.xpose.msrb.mxu2 %v594_v44  ;;  %v619_v44 = vsub.f32 %v1383_v6, %v618_v3 }
 0x1cf   :  { %671 = vmatpush.xpose.msrb.mxu0 %v1343_v45 }
 0x1d0   :  { %v620_v45 = vand.u32 4294901760, %v619_v44 }
 0x1d1   :  { %520 = vmatpush.xpose.msra.mxu3 %v1339_v43  ;;  %716 = vmatpush.xpose.msrb.mxu1 %v1339_v43 }
 0x1d2   :  { %775 = vmatpush.xpose.msrb.mxu2 %v600_v36  ;;  %v625_v36 = vsub.f32 %v1395_v22, %v624_v1 }
 0x1d3   :  { %674 = vmatpush.xpose.msrb.mxu0 %v1357_v60  ;;  %v632_v60 = vand.u32 4294901760, %v631_v17 }
 0x1d4   :  { %v626_v23 = vand.u32 4294901760, %v625_v36 }
 0x1d5   :  { %522 = vmatpush.xpose.msra.mxu3 %v1353_v53  ;;  %718 = vmatpush.xpose.msrb.mxu1 %v1353_v53 }
 0x1d6   :  { %779 = vmatpush.xpose.msrb.mxu2 %v606_v7 }
 0x1d7   :  { %677 = vmatpush.xpose.msrb.mxu0 %v1371_v9 }
 0x1d9   :  { %524 = vmatpush.xpose.msra.mxu3 %v1367_v5  ;;  %720 = vmatpush.xpose.msrb.mxu1 %v1367_v5 }
 0x1da   :  { %783 = vmatpush.xpose.msrb.mxu2 %v612_v13 }
 0x1db   :  { %680 = vmatpush.xpose.msrb.mxu0 %v1383_v6 }
 0x1dd   :  { %526 = vmatpush.xpose.msra.mxu3 %v1379_v12  ;;  %722 = vmatpush.xpose.msrb.mxu1 %v1379_v12 }
 0x1de   :  { %787 = vmatpush.xpose.msrb.mxu2 %v618_v3 }
 0x1df   :  { %683 = vmatpush.xpose.msrb.mxu0 %v1395_v22 }
 0x1e1   :  { %528 = vmatpush.xpose.msra.mxu3 %v1391_v18  ;;  %724 = vmatpush.xpose.msrb.mxu1 %v1391_v18 }
 0x1e2   :  { %791 = vmatpush.xpose.msrb.mxu2 %v624_v1 }
 0x1e3   :  { %686 = vmatpush.xpose.msrb.mxu0 %v629_v29 }
 0x1e4   :  { %728 = vmatmul.f32.vlgmr.msrb.gmra.mxu1 %v531_v15  ;;  %534 = vmatmul.f32.vlgmr.msra.gmra.mxu3 %v533_v16 }
 0x1e5   :  { %543 = vmatpush.xpose.msrb.mxu3 %v542_v28 }
 0x1e6   :  { %795 = vmatpush.xpose.msrb.mxu2 %v630_v46  ;;  %689 = vmatmul.f32.vlgmr.msrb.gmra.mxu0 %v530_v2 }
 0x1e9   :  { %549 = vmatpush.xpose.msrb.mxu3 %v548_v47  ;;  %797 = vmatmul.f32.vlgmr.msrb.gmra.mxu2 %v529_v57 }
 0x1ed   :  { %555 = vmatpush.xpose.msrb.mxu3 %v554_v34 }
 0x1f1   :  { %561 = vmatpush.xpose.msrb.mxu3 %v560_v56 }
 0x1f5   :  { %567 = vmatpush.xpose.msrb.mxu3 %v566_v0 }
 0x1f9   :  { %573 = vmatpush.xpose.msrb.mxu3 %v572_v10 }
 0x1fd   :  { %579 = vmatpush.xpose.msrb.mxu3 %v578_v51 }
 0x201   :  { %585 = vmatpush.xpose.msrb.mxu3 %v584_v20 }
 0x205   :  { %591 = vmatpush.xpose.msrb.mxu3 %v590_v21 }
 0x209   :  { %597 = vmatpush.xpose.msrb.mxu3 %v596_v4 }
 0x20d   :  { %603 = vmatpush.xpose.msrb.mxu3 %v602_v31 }
 0x211   :  { %609 = vmatpush.xpose.msrb.mxu3 %v608_v32 }
 0x215   :  { %615 = vmatpush.xpose.msrb.mxu3 %v614_v38 }
 0x219   :  { %621 = vmatpush.xpose.msrb.mxu3 %v620_v45 }
 0x21d   :  { %627 = vmatpush.xpose.msrb.mxu3 %v626_v23 }
 0x221   :  { %633 = vmatpush.xpose.msrb.mxu3 %v632_v60 }
 0x224   :  { %635 = vmatmul.f32.vlgmr.msrb.gmra.mxu3 %v529_v57 }
 0x225   :  { %802 = vmatpush.xpose.msra.mxu3 %v1203_v40 }
 0x229   :  { %804 = vmatpush.xpose.msra.mxu3 %v1205_v42  ;;  %v445_v42 = vstv %s1483_s8 }
 0x22d   :  { %806 = vmatpush.xpose.msra.mxu3 %v1216_v48 }
 0x231   :  { %808 = vmatpush.xpose.msra.mxu3 %v1228_v55 }
 0x235   :  { %810 = vmatpush.xpose.msra.mxu3 %v1241_v63 }
 0x239   :  { %812 = vmatpush.xpose.msra.mxu3 %v1255_v8 }
 0x23d   :  { %814 = vmatpush.xpose.msra.mxu3 %v1269_v14 }
 0x241   :  { %816 = vmatpush.xpose.msra.mxu3 %v1283_v19 }
 0x245   :  { %818 = vmatpush.xpose.msra.mxu3 %v1297_v25 }
 0x249   :  { %820 = vmatpush.xpose.msra.mxu3 %v1311_v30 }
 0x24d   :  { %822 = vmatpush.xpose.msra.mxu3 %v1325_v35 }
 0x251   :  { %824 = vmatpush.xpose.msra.mxu3 %v1339_v43 }
 0x255   :  { %826 = vmatpush.xpose.msra.mxu3 %v1353_v53 }
 0x259   :  { %828 = vmatpush.xpose.msra.mxu3 %v1367_v5 }
 0x25d   :  { %830 = vmatpush.xpose.msra.mxu3 %v1379_v12 }
 0x261   :  { %832 = vmatpush.xpose.msra.mxu3 %v1391_v18  ;;  %v729_v19 = vpop.f32.mrf.mxu1 }
 0x263   :  { %v690_v8 = vpop.f32.mrf.mxu0 }
 0x264   :  { %834 = vmatmul.f32.vlgmr.msra.gmra.mxu3 %v529_v57 }
 0x267   :  { %v535_v40 = vpop.f32.mrf.mxu3 }
 0x268   :  { %v536_v48 = vadd.f32 %v535_v40, %v445_v42 }
 0x26c   :  { %v798_v30 = vpop.f32.mrf.mxu2 }
 0x2a7   :  { %v636_v55 = vpop.f32.mrf.mxu3 }
 0x2a8   :  { %v637_v63 = vadd.f32 %v636_v55, %v536_v48 }
 0x2aa   :  { %v691_v14 = vadd.f32 %v690_v8, %v637_v63 }
 0x2ac   :  { %v730_v25 = vadd.f32 %v729_v19, %v691_v14 }
 0x2ae   :  { %v799_v35 = vadd.f32 %v798_v30, %v730_v25 }
 0x2e7   :  { %v835_v43 = vpop.f32.mrf.mxu3 }
 0x2e8   :  { %v836_v53 = vadd.f32 %v835_v43, %v799_v35 }
 0x2ea   :  { %838 = vst [vmem:[#allocation9] sm:$0x1] %v836_v53 }
 0x2eb   :  { %849 = dma.vmem_to_hbm [thread:$0]  %s845_s18, 16, %s847_s21, [#allocation5]  }
 0x2ec   :  { %1006 = dma.done.wait [#allocation5], 16  }
 0x2ed   :  { %1007 = vsyncadd [#allocation5], 4294967280 }
 0x2ee   :  { %854 = vsyncpa [#allocation4], 1 }
 0x2ef   :  { %855 = vsyncpa [#allocation7], 1 }
 0x2f0   :  { %856 = vsyncpa [#allocation5], 1 }

</bundles_post_ra>
